<compile_context>
chip_gen: v5e
topology: v5e:2x2
jax: 0.10.0
libtpu: 0.0.40
codegen_flags: <defaults>
</compile_context>

<pallas_src>
import functools

import jax
import jax.numpy as jnp
from jax.experimental import pallas as pl
from jax.experimental.pallas import tpu as pltpu


def _round_up(x, m):
    return (x + m - 1) // m * m


def _linear_kernel(x_ref, w_ref, b_ref, o_ref, *, fun):
    # Single-K-tile fast path: one MXU matmul + bias (+ optional inverse link), all in VMEM.
    y = jnp.dot(x_ref[...], w_ref[...], preferred_element_type=jnp.float32) + b_ref[...]
    if fun is not None:
        y = fun(y)
    o_ref[...] = y.astype(o_ref.dtype)


def _linear_acc_kernel(x_ref, w_ref, b_ref, o_ref, acc_ref, *, fun):
    # K-tiled path: f32 accumulator in VMEM, init at k==0, finalize (bias + fun) at k==last.
    @pl.when(pl.program_id(2) == 0)
    def _():
        acc_ref[...] = jnp.zeros_like(acc_ref)

    acc_ref[...] += jnp.dot(x_ref[...], w_ref[...], preferred_element_type=jnp.float32)

    @pl.when(pl.program_id(2) == pl.num_programs(2) - 1)
    def _():
        y = acc_ref[...] + b_ref[...]
        if fun is not None:
            y = fun(y)
        o_ref[...] = y.astype(o_ref.dtype)


def _tile_vmem_bytes(bb, bk, bn, w_single_buffer, k_tiled, in_bytes):
    x_bytes = 2 * bb * bk * in_bytes                      # double-buffered x tile
    w_bytes = (1 if w_single_buffer else 2) * bk * bn * in_bytes
    o_bytes = 2 * bb * bn * 4                             # double-buffered f32 output tile
    acc_bytes = bb * bn * 4 if k_tiled else 0             # f32 accumulator scratch
    b_bytes = 2 * bn * 4
    return x_bytes + w_bytes + o_bytes + acc_bytes + b_bytes


def _choose_tiles(B, F_pad, N_pad, block_b, block_n, block_k, in_bytes, budget):
    # Batch tile: large enough to amortize ~0.35us/step grid overhead and fill the MXU rows.
    bb = min(block_b, max(8, _round_up(B, 8)))
    # N tile: MXU-native multiple of 128 that divides the (padded) output width.
    if block_n is not None:
        bn = block_n
    elif N_pad <= 512:
        bn = N_pad
    else:
        bn = next(c for c in (512, 256, 128) if N_pad % c == 0)
    # K tile: largest 128-multiple divisor of F_pad whose resident buffers fit the VMEM
    # budget (full-F when possible; otherwise K-tile so the weight also fits v7x's 64 MiB).
    if block_k is not None:
        bk = block_k
    else:
        cands = [F_pad] + [c for c in (8192, 4096, 2048, 1024, 512, 256, 128)
                           if c < F_pad and F_pad % c == 0]
        bk = cands[-1]
        for c in cands:
            single = (c == F_pad and bn == N_pad)
            if _tile_vmem_bytes(bb, c, bn, single, c != F_pad, in_bytes) <= budget:
                bk = c
                break
    assert N_pad % bn == 0 and F_pad % bk == 0, "block_n/block_k must divide padded dims"
    return bb, bn, bk


@functools.partial(
    jax.jit,
    static_argnames=("fun", "block_b", "block_n", "block_k", "compute_dtype",
                     "vmem_budget_bytes"),
)
def lar_forward(x, w_t, b=None, *, fun=None, block_b=256, block_n=None, block_k=None,
                compute_dtype=jnp.bfloat16, vmem_budget_bytes=40 * 1024 * 1024):
    """Forward pass of LAR_torch_regressor: y = x @ w_t + b, then fun(y) if fun is not None.

    x:   (B, N*p)  float32   batch of flattened X[:, t:t+p] windows
    w_t: (N*p, N)  float32   transposed nn.Linear weight (so out = x @ w_t)
    b:   (N,) or (1, N) float32, or None

    block_b: batch tile; sweep 128/256/512 (128 suits v5e's 4x128 MXU, 256 suits v6e/v7x).
    compute_dtype: matmul operand dtype (bf16 default; accumulation is always f32).

    NOTE: for tiny problems (the default LAR example is ~1 Kflop) a plain `x @ w_t + b` in
    XLA beats any custom kernel; this kernel pays off once many AR windows are batched.
    """
    B, F = x.shape
    Fw, N = w_t.shape
    assert Fw == F, "x feature dim must match w_t rows"
    if b is None:
        b = jnp.zeros((N,), jnp.float32)
    b = jnp.asarray(b, jnp.float32).reshape(1, N)

    in_bytes = jnp.dtype(compute_dtype).itemsize
    F_pad = _round_up(F, 128)
    N_pad = _round_up(N, 128)
    bb, bn, bk = _choose_tiles(B, F_pad, N_pad, block_b, block_n, block_k,
                               in_bytes, vmem_budget_bytes)
    B_pad = _round_up(B, bb)
    gi, gj, gk = B_pad // bb, N_pad // bn, F_pad // bk

    # Zero-pad to tiled, lane-dense shapes (exact: padded rows/cols contribute zeros) and
    # cast the matmul operands; bias stays f32 and is added after the f32 accumulation.
    xp = jnp.pad(x, ((0, B_pad - B), (0, F_pad - F))).astype(compute_dtype)
    wp = jnp.pad(w_t, ((0, F_pad - F), (0, N_pad - N))).astype(compute_dtype)
    bp = jnp.pad(b, ((0, 0), (0, N_pad - N)))

    # Blocks that never change across the grid get a single VMEM buffer (halves the resident
    # weight footprint; matters most under v7x's 64 MiB VMEM).
    w_invariant = (gj == 1 and gk == 1)
    w_spec = (pl.BlockSpec((bk, bn), lambda i, j, k: (k, j), pipeline_mode=pl.Buffered(1))
              if w_invariant else
              pl.BlockSpec((bk, bn), lambda i, j, k: (k, j)))
    b_spec = (pl.BlockSpec((1, bn), lambda i, j, k: (0, j), pipeline_mode=pl.Buffered(1))
              if gj == 1 else
              pl.BlockSpec((1, bn), lambda i, j, k: (0, j)))

    k_tiled = gk > 1
    kernel = functools.partial(_linear_acc_kernel if k_tiled else _linear_kernel, fun=fun)
    scratch = (pltpu.VMEM((bb, bn), jnp.float32),) if k_tiled else ()

    required = _tile_vmem_bytes(bb, bk, bn, w_invariant, k_tiled, in_bytes)
    # Explicit VMEM budget: raise above the scoped default, stay under v7x's 64 MiB physical.
    vmem_limit = int(min(56 * 1024 * 1024,
                         max(32 * 1024 * 1024, required + 8 * 1024 * 1024)))

    out = pl.pallas_call(
        kernel,
        out_shape=jax.ShapeDtypeStruct((B_pad, N_pad), jnp.float32),
        grid_spec=pltpu.PrefetchScalarGridSpec(
            num_scalar_prefetch=0,
            grid=(gi, gj, gk),
            in_specs=[
                pl.BlockSpec((bb, bk), lambda i, j, k: (i, k)),   # batch x K tile of x
                w_spec,                                           # K x N tile of weight
                b_spec,                                           # bias row
            ],
            out_specs=pl.BlockSpec((bb, bn), lambda i, j, k: (i, j)),
            scratch_shapes=scratch,
        ),
        compiler_params=pltpu.CompilerParams(
            # batch and N axes shard across TensorCores (2x on v7x); K is the reduction axis.
            dimension_semantics=("parallel", "parallel", "arbitrary"),
            vmem_limit_bytes=vmem_limit,
        ),
    )(xp, wp, bp)
    return out[:B, :N]


def init_lar_params(key, N, p):
    """Deterministic init matching nn.Linear(N*p, N) defaults: U(-1/sqrt(in), 1/sqrt(in)).

    Returns the weight already transposed to (N*p, N) so the kernel computes x @ w_t,
    plus the bias as (1, N).
    """
    in_features = N * p
    k_w, k_b = jax.random.split(key)
    bound = 1.0 / jnp.sqrt(jnp.float32(in_features))
    weight = jax.random.uniform(
        k_w, (N, in_features), dtype=jnp.float32, minval=-bound, maxval=bound
    )
    bias = jax.random.uniform(
        k_b, (N,), dtype=jnp.float32, minval=-bound, maxval=bound
    )
    return weight.T, bias.reshape(1, N)


if __name__ == "__main__":
    ref_dot = lambda a, bb_: jnp.dot(a, bb_, precision=jax.lax.Precision.HIGHEST)

    # Small shapes consistent with the module: N-dim process, lag p, batch of T windows.
    N, p, B = 4, 8, 8
    key = jax.random.PRNGKey(0)
    k_x, k_params = jax.random.split(key)
    x = jax.random.normal(k_x, (B, N * p), dtype=jnp.float32)  # flattened X[:, t:t+p] windows
    w_t, b = init_lar_params(k_params, N, p)
    y_ref = ref_dot(x, w_t) + b

    # 1) default path: bf16 operands, f32 accumulation, lane-dense padded output (fun=None).
    y = lar_forward(x, w_t, b)
    jax.block_until_ready(y)
    assert y.shape == (B, N)
    assert jnp.allclose(y, y_ref, atol=5e-2, rtol=5e-2), "bf16 path mismatch vs reference"

    # 2) f32 operand path, tight tolerance.
    y32 = lar_forward(x, w_t, b, compute_dtype=jnp.float32)
    jax.block_until_ready(y32)
    assert jnp.allclose(y32, y_ref, atol=1e-5, rtol=1e-5), "f32 path mismatch vs reference"

    # 3) multi-tile grid: forced batch/K tiling exercises the accumulator + pl.when path,
    #    with a fused inverse link `fun` (e.g. exp for a Poisson-style link).
    N2, p2, B2 = 4, 64, 40
    k_x2, k_p2 = jax.random.split(jax.random.PRNGKey(1))
    x2 = jax.random.normal(k_x2, (B2, N2 * p2), dtype=jnp.float32)
    w_t2, b2 = init_lar_params(k_p2, N2, p2)
    y2 = lar_forward(x2, w_t2, b2, fun=jnp.exp, compute_dtype=jnp.float32,
                     block_b=16, block_k=128)
    jax.block_until_ready(y2)
    y2_ref = jnp.exp(ref_dot(x2, w_t2) + b2)
    assert y2.shape == (B2, N2)
    assert jnp.allclose(y2, y2_ref, atol=1e-4, rtol=1e-4), "tiled path mismatch vs reference"

    print("KERNEL_OK")
</pallas_src>

<mosaic_0001>
module attributes {stable_mosaic.version = 11 : i64} {
  func.func @_linear_kernel(%arg0: i32, %arg1: i32, %arg2: i32, %arg3: memref<8x128xbf16, #tpu.memory_space<vmem>>, %arg4: memref<128x128xbf16, #tpu.memory_space<vmem>>, %arg5: memref<1x128xf32, #tpu.memory_space<vmem>>, %arg6: memref<8x128xf32, #tpu.memory_space<vmem>>) attributes {dimension_semantics = [#tpu.dimension_semantics<parallel>, #tpu.dimension_semantics<parallel>, #tpu.dimension_semantics<arbitrary>], iteration_bounds = array<i64: 1, 1, 1>, scalar_prefetch = 0 : i64, scratch_operands = 0 : i64, tpu.core_type = #tpu.core_type<tc>, window_params = [{transform_indices = @transform_0, window_bounds = array<i64: 8, 128>}, {pipeline_mode = #tpu.pipeline_mode<synchronous>, transform_indices = @transform_1, window_bounds = array<i64: 128, 128>}, {pipeline_mode = #tpu.pipeline_mode<synchronous>, transform_indices = @transform_2, window_bounds = array<i64: 1, 128>}, {transform_indices = @transform_3, window_bounds = array<i64: 8, 128>}]} {
    %c0 = arith.constant 0 : index
    %c0_0 = arith.constant 0 : index
    %0 = vector.load %arg3[%c0, %c0_0] : memref<8x128xbf16, #tpu.memory_space<vmem>>, vector<8x128xbf16>
    %c0_1 = arith.constant 0 : index
    %c0_2 = arith.constant 0 : index
    %1 = vector.load %arg4[%c0_1, %c0_2] : memref<128x128xbf16, #tpu.memory_space<vmem>>, vector<128x128xbf16>
    %cst = arith.constant dense<0.000000e+00> : vector<8x128xf32>
    %2 = tpu.matmul %0, %1, %cst {dimension_numbers = #tpu.dot_dimension_numbers<[1], [0], [0], [1], [0, 0, 1, 1], [], []>} : vector<8x128xbf16>, vector<128x128xbf16>, vector<8x128xf32> -> vector<8x128xf32>
    %c0_3 = arith.constant 0 : index
    %c0_4 = arith.constant 0 : index
    %3 = vector.load %arg5[%c0_3, %c0_4] : memref<1x128xf32, #tpu.memory_space<vmem>>, vector<1x128xf32>
    %4 = vector.broadcast %3 : vector<1x128xf32> to vector<8x128xf32>
    %5 = arith.addf %2, %4 : vector<8x128xf32>
    %c0_5 = arith.constant 0 : index
    %c0_6 = arith.constant 0 : index
    %6 = vector.load %arg6[%c0_5, %c0_6] : memref<8x128xf32, #tpu.memory_space<vmem>>, vector<8x128xf32>
    tpu.vector_store %arg6[%c0_5, %c0_6], %5 {strides = array<i32>} : memref<8x128xf32, #tpu.memory_space<vmem>>, vector<8x128xf32>,
    return
  }
  func.func @transform_0(%arg0: i32, %arg1: i32, %arg2: i32) -> (i32, i32) {
    %c0_i32 = arith.constant 0 : i32
    return %arg0, %arg2 : i32, i32
  }
  func.func @transform_1(%arg0: i32, %arg1: i32, %arg2: i32) -> (i32, i32) {
    %c0_i32 = arith.constant 0 : i32
    return %arg2, %arg1 : i32, i32
  }
  func.func @transform_2(%arg0: i32, %arg1: i32, %arg2: i32) -> (i32, i32) {
    %c0_i32 = arith.constant 0 : i32
    %c0_i32_0 = arith.constant 0 : i32
    return %c0_i32, %arg1 : i32, i32
  }
  func.func @transform_3(%arg0: i32, %arg1: i32, %arg2: i32) -> (i32, i32) {
    %c0_i32 = arith.constant 0 : i32
    return %arg0, %arg1 : i32, i32
  }
}

</mosaic_0001>

<bundles_post_ra>
// kernel: lar_forward.1
= control target key start
LH: loop header
LB: loop body
LE: loop exit
PB: predicated region body
PF: predicated region fallthrough
CT: control target
= control target key end

     0   :  { %s195_s1 = inlined_call_operand.vmem [shape: bf16[128,128], index: 1, kind: input, shape index: {}]   ;;  %s196_s2 = inlined_call_operand.vmem [shape: f32[1,128], index: 2, kind: input, shape index: {}]   ;;  %s197_s0 = inlined_call_operand.vmem [shape: bf16[8,128], index: 0, kind: input, shape index: {}]   ;;  %s198_s3 = inlined_call_operand.vmem [shape: f32[8,128], index: 3, kind: output, shape index: {}]  }
   0x1   :  { %v140_v0 = vld [vmem:[%s195_s1 + $0x38] sm:$0xff]  ;;  %v139_v1 = vld [vmem:[%s195_s1 + $0x30] sm:$0xff]  ;;  %v138_v2 = vld [vmem:[%s195_s1 + $0x28] sm:$0xff] }
   0x2   :  { %83 = vmatpush.bf16.msra.mxu0 %v140_v0  ;;  %v137_v3 = vld [vmem:[%s195_s1 + $0x20] sm:$0xff]  ;;  %v136_v4 = vld [vmem:[%s195_s1 + $0x18] sm:$0xff]  ;;  %v135_v5 = vld [vmem:[%s195_s1 + $0x10] sm:$0xff] }
   0x3   :  { %v134_v6 = vld [vmem:[%s195_s1 + $0x8] sm:$0xff]  ;;  %v133_v7 = vld [vmem:[%s195_s1] sm:$0xff] }
   0x4   :  { %v14_v8 = vld [vmem:[%s197_s0] sm:$0xf] }
   0x5   :  { %v141_v9 = vld [vmem:[%s196_s2] ss:$0 sm:$0xff] }
   0x6   :  { %84 = vmatpush.bf16.msra.mxu0 %v139_v1 }
   0xa   :  { %85 = vmatpush.bf16.msra.mxu0 %v138_v2 }
   0xe   :  { %86 = vmatpush.bf16.msra.mxu0 %v137_v3 }
  0x12   :  { %87 = vmatpush.bf16.msra.mxu0 %v136_v4 }
  0x16   :  { %88 = vmatpush.bf16.msra.mxu0 %v135_v5 }
  0x1a   :  { %89 = vmatpush.bf16.msra.mxu0 %v134_v6 }
  0x1e   :  { %90 = vmatpush.bf16.msra.mxu0 %v133_v7 }
  0x21   :  { %91 = vmatmul.bf16.vlgmr.msra.gmra.mxu0 %v14_v8 }
  0x9e   :  { %v92_v10 = vpop.f32.mrf.mxu0 }
  0x9f   :  { %v93_v11 = vadd.f32 %v141_v9, %v92_v10 }
  0xa1   :  { %96 = vst [vmem:[%s198_s3] sm:$0xff] %v93_v11 }
  0xa6   :  { %v94_v12 = vpop.f32.mrf.mxu0 }

</bundles_post_ra>
